<compile_context>
chip_gen: v7x
topology: tpu7x:2x2x1
jax: 0.10.0
libtpu: 0.0.40
codegen_flags: <defaults>
</compile_context>

<pallas_src>
import math
import functools

import numpy as np
import jax
import jax.numpy as jnp
from jax.experimental import pallas as pl
from jax.experimental.pallas import tpu as pltpu


def encoder_layer(x, mask_bool, params, *, heads):
    """Pallas equivalent of EncoderLayer(dim_z, heads).forward(x, mask).

    x:         (B, S, D) float32
    mask_bool: (B, S) bool, True = masked (filled with -inf before softmax)
    params:    (Wq, Wo, W1, b1, W2, b2, g1, be1, g2, be2); weights stored as
               (in, out) (i.e. transposed relative to torch.nn.Linear.weight).
    """
    Wq, Wo, W1, b1, W2, b2, g1, be1, g2, be2 = params
    B, S, D = x.shape
    assert D % heads == 0
    dh = D // heads                       # dim_qk == dim_v == dim_z // heads
    inv_scale = 1.0 / math.sqrt(dh)
    eps = 1e-5

    # (1, D) slabs for lane-dense broadcasts inside the kernel.
    mask_f = mask_bool.astype(jnp.float32).reshape(B, 1, S)
    b1_, b2_ = b1.reshape(1, D), b2.reshape(1, D)
    g1_, be1_ = g1.reshape(1, D), be1.reshape(1, D)
    g2_, be2_ = g2.reshape(1, D), be2.reshape(1, D)

    def kernel(x_ref, m_ref, wq_ref, wo_ref, w1_ref, b1_ref, w2_ref, b2_ref,
               g1_ref, be1_ref, g2_ref, be2_ref, o_ref):
        x_b = x_ref[0]                                    # (S, D)
        m_b = m_ref[0]                                    # (1, S), >0 => masked

        # --- Multi-head self-attention (query_linear reused for Q/K/V) ---
        proj = jnp.dot(x_b, wq_ref[...],
                       preferred_element_type=jnp.float32)  # (S, H*dh)
        wo = wo_ref[...]                                     # (H*dh, D)
        attn = jnp.zeros((S, D), jnp.float32)
        neg_inf = float("-inf")
        for h in range(heads):                               # static, small H
            sl = slice(h * dh, (h + 1) * dh)
            qh = proj[:, sl]                                 # (S, dh)
            kh = qh                                          # module quirk
            vh = qh                                          # module quirk
            scores = jax.lax.dot_general(
                qh, kh, (((1,), (1,)), ((), ())),
                preferred_element_type=jnp.float32) * inv_scale   # (S, S)
            scores = jnp.where(m_b > 0.0, neg_inf, scores)
            mmax = jnp.max(scores, axis=-1, keepdims=True)
            p = jnp.exp(scores - mmax)
            p = p / jnp.sum(p, axis=-1, keepdims=True)
            oh = jnp.dot(p, vh, preferred_element_type=jnp.float32)  # (S, dh)
            # Fold head output directly through its slice of the out-proj.
            attn = attn + jnp.dot(oh, wo[sl, :],
                                  preferred_element_type=jnp.float32)

        # --- residual + LayerNorm 1 ---
        h1 = x_b + attn
        mu = jnp.mean(h1, axis=-1, keepdims=True)
        var = jnp.mean(jnp.square(h1 - mu), axis=-1, keepdims=True)
        h1 = (h1 - mu) * jax.lax.rsqrt(var + eps) * g1_ref[...] + be1_ref[...]

        # --- position-wise FFN (LeakyReLU 0.1) ---
        y = jnp.dot(h1, w1_ref[...],
                    preferred_element_type=jnp.float32) + b1_ref[...]
        y = jnp.where(y > 0, y, 0.1 * y)
        y = jnp.dot(y, w2_ref[...],
                    preferred_element_type=jnp.float32) + b2_ref[...]

        # --- residual + LayerNorm 2 ---
        h2 = h1 + y
        mu2 = jnp.mean(h2, axis=-1, keepdims=True)
        var2 = jnp.mean(jnp.square(h2 - mu2), axis=-1, keepdims=True)
        out = (h2 - mu2) * jax.lax.rsqrt(var2 + eps) * g2_ref[...] + be2_ref[...]
        o_ref[0] = out.astype(o_ref.dtype)

    return pl.pallas_call(
        kernel,
        out_shape=jax.ShapeDtypeStruct((B, S, D), jnp.float32),
        grid=(B,),
        in_specs=[
            pl.BlockSpec((1, S, D), lambda b: (b, 0, 0)),   # x
            pl.BlockSpec((1, 1, S), lambda b: (b, 0, 0)),   # mask
            pl.BlockSpec((D, D), lambda b: (0, 0)),         # Wq
            pl.BlockSpec((D, D), lambda b: (0, 0)),         # Wo
            pl.BlockSpec((D, D), lambda b: (0, 0)),         # W1
            pl.BlockSpec((1, D), lambda b: (0, 0)),         # b1
            pl.BlockSpec((D, D), lambda b: (0, 0)),         # W2
            pl.BlockSpec((1, D), lambda b: (0, 0)),         # b2
            pl.BlockSpec((1, D), lambda b: (0, 0)),         # gamma1
            pl.BlockSpec((1, D), lambda b: (0, 0)),         # beta1
            pl.BlockSpec((1, D), lambda b: (0, 0)),         # gamma2
            pl.BlockSpec((1, D), lambda b: (0, 0)),         # beta2
        ],
        out_specs=pl.BlockSpec((1, S, D), lambda b: (b, 0, 0)),
        compiler_params=pltpu.CompilerParams(
            dimension_semantics=("parallel",)),
    )(x, mask_f, Wq, Wo, W1, b1_, W2, b2_, g1_, be1_, g2_, be2_)


def _reference(x, mask_bool, params, heads, eps=1e-5):
    """Pure-JAX reference of the same forward (incl. the query_linear quirk)."""
    Wq, Wo, W1, b1, W2, b2, g1, be1, g2, be2 = params
    B, S, D = x.shape
    dh = D // heads
    proj = x @ Wq
    ph = proj.reshape(B, S, heads, dh).transpose(0, 2, 1, 3)       # (B,H,S,dh)
    scores = jnp.einsum("bhqd,bhkd->bhqk", ph, ph) / math.sqrt(dh)
    scores = jnp.where(mask_bool[:, None, None, :], -jnp.inf, scores)
    p = jax.nn.softmax(scores, axis=-1)
    ctx = jnp.einsum("bhqk,bhkd->bhqd", p, ph).transpose(0, 2, 1, 3)
    attn = ctx.reshape(B, S, D) @ Wo

    def ln(v, g, b):
        mu = v.mean(-1, keepdims=True)
        var = ((v - mu) ** 2).mean(-1, keepdims=True)
        return (v - mu) / jnp.sqrt(var + eps) * g + b

    h1 = ln(x + attn, g1, be1)
    y = h1 @ W1 + b1
    y = jnp.where(y > 0, y, 0.1 * y)
    y = y @ W2 + b2
    return ln(h1 + y, g2, be2)


if __name__ == "__main__":
    B, S, D, H = 2, 8, 32, 4

    keys = jax.random.split(jax.random.PRNGKey(0), 11)
    wscale = 1.0 / math.sqrt(D)
    Wq = jax.random.normal(keys[0], (D, D), jnp.float32) * wscale
    Wo = jax.random.normal(keys[1], (D, D), jnp.float32) * wscale
    W1 = jax.random.normal(keys[2], (D, D), jnp.float32) * wscale
    b1 = jax.random.normal(keys[3], (D,), jnp.float32) * 0.1
    W2 = jax.random.normal(keys[4], (D, D), jnp.float32) * wscale
    b2 = jax.random.normal(keys[5], (D,), jnp.float32) * 0.1
    g1 = 1.0 + 0.1 * jax.random.normal(keys[6], (D,), jnp.float32)
    be1 = 0.1 * jax.random.normal(keys[7], (D,), jnp.float32)
    g2 = 1.0 + 0.1 * jax.random.normal(keys[8], (D,), jnp.float32)
    be2 = 0.1 * jax.random.normal(keys[9], (D,), jnp.float32)
    params = (Wq, Wo, W1, b1, W2, b2, g1, be1, g2, be2)

    x = jax.random.normal(keys[10], (B, S, D), jnp.float32)
    # Deterministic mask: batch 0 fully visible, batch 1 masks last 2 keys.
    mask_bool = jnp.array(
        [[False] * S, [False] * (S - 2) + [True] * 2], dtype=jnp.bool_)

    out = encoder_layer(x, mask_bool, params, heads=H)
    out = jax.block_until_ready(out)

    ref = _reference(x, mask_bool, params, H)
    assert out.shape == (B, S, D) and out.dtype == jnp.float32
    np.testing.assert_allclose(np.asarray(out), np.asarray(ref),
                               rtol=1e-4, atol=1e-4)

    print("KERNEL_OK")
</pallas_src>

<mosaic_0001>
module attributes {stable_mosaic.version = 11 : i64} {
  func.func @kernel(%arg0: i32, %arg1: memref<1x8x32xf32, #tpu.memory_space<vmem>>, %arg2: memref<1x1x8xf32, #tpu.memory_space<vmem>>, %arg3: memref<32x32xf32, #tpu.memory_space<vmem>>, %arg4: memref<32x32xf32, #tpu.memory_space<vmem>>, %arg5: memref<32x32xf32, #tpu.memory_space<vmem>>, %arg6: memref<1x32xf32, #tpu.memory_space<vmem>>, %arg7: memref<32x32xf32, #tpu.memory_space<vmem>>, %arg8: memref<1x32xf32, #tpu.memory_space<vmem>>, %arg9: memref<1x32xf32, #tpu.memory_space<vmem>>, %arg10: memref<1x32xf32, #tpu.memory_space<vmem>>, %arg11: memref<1x32xf32, #tpu.memory_space<vmem>>, %arg12: memref<1x32xf32, #tpu.memory_space<vmem>>, %arg13: memref<1x8x32xf32, #tpu.memory_space<vmem>>) attributes {dimension_semantics = [#tpu.dimension_semantics<parallel>], iteration_bounds = array<i64: 2>, scalar_prefetch = 0 : i64, scratch_operands = 0 : i64, tpu.core_type = #tpu.core_type<tc>, window_params = [{transform_indices = @transform_0, window_bounds = array<i64: 1, 8, 32>}, {transform_indices = @transform_1, window_bounds = array<i64: 1, 1, 8>}, {pipeline_mode = #tpu.pipeline_mode<synchronous>, transform_indices = @transform_2, window_bounds = array<i64: 32, 32>}, {pipeline_mode = #tpu.pipeline_mode<synchronous>, transform_indices = @transform_3, window_bounds = array<i64: 32, 32>}, {pipeline_mode = #tpu.pipeline_mode<synchronous>, transform_indices = @transform_4, window_bounds = array<i64: 32, 32>}, {pipeline_mode = #tpu.pipeline_mode<synchronous>, transform_indices = @transform_5, window_bounds = array<i64: 1, 32>}, {pipeline_mode = #tpu.pipeline_mode<synchronous>, transform_indices = @transform_6, window_bounds = array<i64: 32, 32>}, {pipeline_mode = #tpu.pipeline_mode<synchronous>, transform_indices = @transform_7, window_bounds = array<i64: 1, 32>}, {pipeline_mode = #tpu.pipeline_mode<synchronous>, transform_indices = @transform_8, window_bounds = array<i64: 1, 32>}, {pipeline_mode = #tpu.pipeline_mode<synchronous>, transform_indices = @transform_9, window_bounds = array<i64: 1, 32>}, {pipeline_mode = #tpu.pipeline_mode<synchronous>, transform_indices = @transform_10, window_bounds = array<i64: 1, 32>}, {pipeline_mode = #tpu.pipeline_mode<synchronous>, transform_indices = @transform_11, window_bounds = array<i64: 1, 32>}, {transform_indices = @transform_12, window_bounds = array<i64: 1, 8, 32>}]} {
    %c0 = arith.constant 0 : index
    %c0_0 = arith.constant 0 : index
    %c0_1 = arith.constant 0 : index
    %0 = vector.load %arg1[%c0, %c0_0, %c0_1] : memref<1x8x32xf32, #tpu.memory_space<vmem>>, vector<1x8x32xf32>
    %1 = vector.shape_cast %0 : vector<1x8x32xf32> to vector<8x32xf32>
    %c0_2 = arith.constant 0 : index
    %c0_3 = arith.constant 0 : index
    %c0_4 = arith.constant 0 : index
    %2 = vector.load %arg2[%c0_2, %c0_3, %c0_4] : memref<1x1x8xf32, #tpu.memory_space<vmem>>, vector<1x1x8xf32>
    %3 = vector.shape_cast %2 : vector<1x1x8xf32> to vector<1x8xf32>
    %c0_5 = arith.constant 0 : index
    %c0_6 = arith.constant 0 : index
    %4 = vector.load %arg3[%c0_5, %c0_6] : memref<32x32xf32, #tpu.memory_space<vmem>>, vector<32x32xf32>
    %cst = arith.constant dense<0.000000e+00> : vector<8x32xf32>
    %5 = tpu.matmul %1, %4, %cst {dimension_numbers = #tpu.dot_dimension_numbers<[1], [0], [0], [1], [0, 0, 1, 1], [], []>} : vector<8x32xf32>, vector<32x32xf32>, vector<8x32xf32> -> vector<8x32xf32>
    %c0_7 = arith.constant 0 : index
    %c0_8 = arith.constant 0 : index
    %6 = vector.load %arg4[%c0_7, %c0_8] : memref<32x32xf32, #tpu.memory_space<vmem>>, vector<32x32xf32>
    %cst_9 = arith.constant 0.000000e+00 : f32
    %7 = vector.broadcast %cst_9 : f32 to vector<8x32xf32>
    %8 = vector.extract_strided_slice %5 {offsets = [0, 0], sizes = [8, 8], strides = [1, 1]} : vector<8x32xf32> to vector<8x8xf32>
    %cst_10 = arith.constant dense<0.000000e+00> : vector<8x8xf32>
    %9 = tpu.matmul %8, %8, %cst_10 {dimension_numbers = #tpu.dot_dimension_numbers<[1], [1], [0], [0], [0, 0, 1, 0], [], []>} : vector<8x8xf32>, vector<8x8xf32>, vector<8x8xf32> -> vector<8x8xf32>
    %cst_11 = arith.constant 0.353553385 : f32
    %10 = vector.broadcast %cst_11 : f32 to vector<8x8xf32>
    %11 = arith.mulf %9, %10 : vector<8x8xf32>
    %cst_12 = arith.constant 0.000000e+00 : f32
    %12 = vector.broadcast %cst_12 : f32 to vector<1x8xf32>
    %13 = arith.cmpf ogt, %3, %12 : vector<1x8xf32>
    %cst_13 = arith.constant 0xFF800000 : f32
    %14 = vector.shape_cast %13 : vector<1x8xi1> to vector<1x8xi1>
    %15 = vector.broadcast %14 : vector<1x8xi1> to vector<8x8xi1>
    %16 = vector.broadcast %cst_13 : f32 to vector<8x8xf32>
    %17 = arith.select %15, %16, %11 : vector<8x8xi1>, vector<8x8xf32>
    %cst_14 = arith.constant dense<0xFF800000> : vector<8xf32>
    %18 = vector.multi_reduction <maximumf>, %17, %cst_14 [1] : vector<8x8xf32> to vector<8xf32>
    %19 = vector.shape_cast %18 : vector<8xf32> to vector<8x1xf32>
    %20 = vector.broadcast %19 : vector<8x1xf32> to vector<8x8xf32>
    %21 = arith.subf %17, %20 : vector<8x8xf32>
    %22 = math.exp %21 : vector<8x8xf32>
    %cst_15 = arith.constant dense<0.000000e+00> : vector<8xf32>
    %23 = vector.multi_reduction <add>, %22, %cst_15 [1] : vector<8x8xf32> to vector<8xf32>
    %24 = vector.shape_cast %23 : vector<8xf32> to vector<8x1xf32>
    %25 = vector.broadcast %24 : vector<8x1xf32> to vector<8x8xf32>
    %26 = arith.divf %22, %25 : vector<8x8xf32>
    %cst_16 = arith.constant dense<0.000000e+00> : vector<8x8xf32>
    %27 = tpu.matmul %26, %8, %cst_16 {dimension_numbers = #tpu.dot_dimension_numbers<[1], [0], [0], [1], [0, 0, 1, 1], [], []>} : vector<8x8xf32>, vector<8x8xf32>, vector<8x8xf32> -> vector<8x8xf32>
    %28 = vector.extract_strided_slice %6 {offsets = [0, 0], sizes = [8, 32], strides = [1, 1]} : vector<32x32xf32> to vector<8x32xf32>
    %cst_17 = arith.constant dense<0.000000e+00> : vector<8x32xf32>
    %29 = tpu.matmul %27, %28, %cst_17 {dimension_numbers = #tpu.dot_dimension_numbers<[1], [0], [0], [1], [0, 0, 1, 1], [], []>} : vector<8x8xf32>, vector<8x32xf32>, vector<8x32xf32> -> vector<8x32xf32>
    %30 = arith.addf %7, %29 : vector<8x32xf32>
    %31 = vector.extract_strided_slice %5 {offsets = [0, 8], sizes = [8, 8], strides = [1, 1]} : vector<8x32xf32> to vector<8x8xf32>
    %cst_18 = arith.constant dense<0.000000e+00> : vector<8x8xf32>
    %32 = tpu.matmul %31, %31, %cst_18 {dimension_numbers = #tpu.dot_dimension_numbers<[1], [1], [0], [0], [0, 0, 1, 0], [], []>} : vector<8x8xf32>, vector<8x8xf32>, vector<8x8xf32> -> vector<8x8xf32>
    %cst_19 = arith.constant 0.353553385 : f32
    %33 = vector.broadcast %cst_19 : f32 to vector<8x8xf32>
    %34 = arith.mulf %32, %33 : vector<8x8xf32>
    %cst_20 = arith.constant 0.000000e+00 : f32
    %35 = vector.broadcast %cst_20 : f32 to vector<1x8xf32>
    %36 = arith.cmpf ogt, %3, %35 : vector<1x8xf32>
    %cst_21 = arith.constant 0xFF800000 : f32
    %37 = vector.shape_cast %36 : vector<1x8xi1> to vector<1x8xi1>
    %38 = vector.broadcast %37 : vector<1x8xi1> to vector<8x8xi1>
    %39 = vector.broadcast %cst_21 : f32 to vector<8x8xf32>
    %40 = arith.select %38, %39, %34 : vector<8x8xi1>, vector<8x8xf32>
    %cst_22 = arith.constant dense<0xFF800000> : vector<8xf32>
    %41 = vector.multi_reduction <maximumf>, %40, %cst_22 [1] : vector<8x8xf32> to vector<8xf32>
    %42 = vector.shape_cast %41 : vector<8xf32> to vector<8x1xf32>
    %43 = vector.broadcast %42 : vector<8x1xf32> to vector<8x8xf32>
    %44 = arith.subf %40, %43 : vector<8x8xf32>
    %45 = math.exp %44 : vector<8x8xf32>
    %cst_23 = arith.constant dense<0.000000e+00> : vector<8xf32>
    %46 = vector.multi_reduction <add>, %45, %cst_23 [1] : vector<8x8xf32> to vector<8xf32>
    %47 = vector.shape_cast %46 : vector<8xf32> to vector<8x1xf32>
    %48 = vector.broadcast %47 : vector<8x1xf32> to vector<8x8xf32>
    %49 = arith.divf %45, %48 : vector<8x8xf32>
    %cst_24 = arith.constant dense<0.000000e+00> : vector<8x8xf32>
    %50 = tpu.matmul %49, %31, %cst_24 {dimension_numbers = #tpu.dot_dimension_numbers<[1], [0], [0], [1], [0, 0, 1, 1], [], []>} : vector<8x8xf32>, vector<8x8xf32>, vector<8x8xf32> -> vector<8x8xf32>
    %51 = vector.extract_strided_slice %6 {offsets = [8, 0], sizes = [8, 32], strides = [1, 1]} : vector<32x32xf32> to vector<8x32xf32>
    %cst_25 = arith.constant dense<0.000000e+00> : vector<8x32xf32>
    %52 = tpu.matmul %50, %51, %cst_25 {dimension_numbers = #tpu.dot_dimension_numbers<[1], [0], [0], [1], [0, 0, 1, 1], [], []>} : vector<8x8xf32>, vector<8x32xf32>, vector<8x32xf32> -> vector<8x32xf32>
    %53 = arith.addf %30, %52 : vector<8x32xf32>
    %54 = vector.extract_strided_slice %5 {offsets = [0, 16], sizes = [8, 8], strides = [1, 1]} : vector<8x32xf32> to vector<8x8xf32>
    %cst_26 = arith.constant dense<0.000000e+00> : vector<8x8xf32>
    %55 = tpu.matmul %54, %54, %cst_26 {dimension_numbers = #tpu.dot_dimension_numbers<[1], [1], [0], [0], [0, 0, 1, 0], [], []>} : vector<8x8xf32>, vector<8x8xf32>, vector<8x8xf32> -> vector<8x8xf32>
    %cst_27 = arith.constant 0.353553385 : f32
    %56 = vector.broadcast %cst_27 : f32 to vector<8x8xf32>
    %57 = arith.mulf %55, %56 : vector<8x8xf32>
    %cst_28 = arith.constant 0.000000e+00 : f32
    %58 = vector.broadcast %cst_28 : f32 to vector<1x8xf32>
    %59 = arith.cmpf ogt, %3, %58 : vector<1x8xf32>
    %cst_29 = arith.constant 0xFF800000 : f32
    %60 = vector.shape_cast %59 : vector<1x8xi1> to vector<1x8xi1>
    %61 = vector.broadcast %60 : vector<1x8xi1> to vector<8x8xi1>
    %62 = vector.broadcast %cst_29 : f32 to vector<8x8xf32>
    %63 = arith.select %61, %62, %57 : vector<8x8xi1>, vector<8x8xf32>
    %cst_30 = arith.constant dense<0xFF800000> : vector<8xf32>
    %64 = vector.multi_reduction <maximumf>, %63, %cst_30 [1] : vector<8x8xf32> to vector<8xf32>
    %65 = vector.shape_cast %64 : vector<8xf32> to vector<8x1xf32>
    %66 = vector.broadcast %65 : vector<8x1xf32> to vector<8x8xf32>
    %67 = arith.subf %63, %66 : vector<8x8xf32>
    %68 = math.exp %67 : vector<8x8xf32>
    %cst_31 = arith.constant dense<0.000000e+00> : vector<8xf32>
    %69 = vector.multi_reduction <add>, %68, %cst_31 [1] : vector<8x8xf32> to vector<8xf32>
    %70 = vector.shape_cast %69 : vector<8xf32> to vector<8x1xf32>
    %71 = vector.broadcast %70 : vector<8x1xf32> to vector<8x8xf32>
    %72 = arith.divf %68, %71 : vector<8x8xf32>
    %cst_32 = arith.constant dense<0.000000e+00> : vector<8x8xf32>
    %73 = tpu.matmul %72, %54, %cst_32 {dimension_numbers = #tpu.dot_dimension_numbers<[1], [0], [0], [1], [0, 0, 1, 1], [], []>} : vector<8x8xf32>, vector<8x8xf32>, vector<8x8xf32> -> vector<8x8xf32>
    %74 = vector.extract_strided_slice %6 {offsets = [16, 0], sizes = [8, 32], strides = [1, 1]} : vector<32x32xf32> to vector<8x32xf32>
    %cst_33 = arith.constant dense<0.000000e+00> : vector<8x32xf32>
    %75 = tpu.matmul %73, %74, %cst_33 {dimension_numbers = #tpu.dot_dimension_numbers<[1], [0], [0], [1], [0, 0, 1, 1], [], []>} : vector<8x8xf32>, vector<8x32xf32>, vector<8x32xf32> -> vector<8x32xf32>
    %76 = arith.addf %53, %75 : vector<8x32xf32>
    %77 = vector.extract_strided_slice %5 {offsets = [0, 24], sizes = [8, 8], strides = [1, 1]} : vector<8x32xf32> to vector<8x8xf32>
    %cst_34 = arith.constant dense<0.000000e+00> : vector<8x8xf32>
    %78 = tpu.matmul %77, %77, %cst_34 {dimension_numbers = #tpu.dot_dimension_numbers<[1], [1], [0], [0], [0, 0, 1, 0], [], []>} : vector<8x8xf32>, vector<8x8xf32>, vector<8x8xf32> -> vector<8x8xf32>
    %cst_35 = arith.constant 0.353553385 : f32
    %79 = vector.broadcast %cst_35 : f32 to vector<8x8xf32>
    %80 = arith.mulf %78, %79 : vector<8x8xf32>
    %cst_36 = arith.constant 0.000000e+00 : f32
    %81 = vector.broadcast %cst_36 : f32 to vector<1x8xf32>
    %82 = arith.cmpf ogt, %3, %81 : vector<1x8xf32>
    %cst_37 = arith.constant 0xFF800000 : f32
    %83 = vector.shape_cast %82 : vector<1x8xi1> to vector<1x8xi1>
    %84 = vector.broadcast %83 : vector<1x8xi1> to vector<8x8xi1>
    %85 = vector.broadcast %cst_37 : f32 to vector<8x8xf32>
    %86 = arith.select %84, %85, %80 : vector<8x8xi1>, vector<8x8xf32>
    %cst_38 = arith.constant dense<0xFF800000> : vector<8xf32>
    %87 = vector.multi_reduction <maximumf>, %86, %cst_38 [1] : vector<8x8xf32> to vector<8xf32>
    %88 = vector.shape_cast %87 : vector<8xf32> to vector<8x1xf32>
    %89 = vector.broadcast %88 : vector<8x1xf32> to vector<8x8xf32>
    %90 = arith.subf %86, %89 : vector<8x8xf32>
    %91 = math.exp %90 : vector<8x8xf32>
    %cst_39 = arith.constant dense<0.000000e+00> : vector<8xf32>
    %92 = vector.multi_reduction <add>, %91, %cst_39 [1] : vector<8x8xf32> to vector<8xf32>
    %93 = vector.shape_cast %92 : vector<8xf32> to vector<8x1xf32>
    %94 = vector.broadcast %93 : vector<8x1xf32> to vector<8x8xf32>
    %95 = arith.divf %91, %94 : vector<8x8xf32>
    %cst_40 = arith.constant dense<0.000000e+00> : vector<8x8xf32>
    %96 = tpu.matmul %95, %77, %cst_40 {dimension_numbers = #tpu.dot_dimension_numbers<[1], [0], [0], [1], [0, 0, 1, 1], [], []>} : vector<8x8xf32>, vector<8x8xf32>, vector<8x8xf32> -> vector<8x8xf32>
    %97 = vector.extract_strided_slice %6 {offsets = [24, 0], sizes = [8, 32], strides = [1, 1]} : vector<32x32xf32> to vector<8x32xf32>
    %cst_41 = arith.constant dense<0.000000e+00> : vector<8x32xf32>
    %98 = tpu.matmul %96, %97, %cst_41 {dimension_numbers = #tpu.dot_dimension_numbers<[1], [0], [0], [1], [0, 0, 1, 1], [], []>} : vector<8x8xf32>, vector<8x32xf32>, vector<8x32xf32> -> vector<8x32xf32>
    %99 = arith.addf %76, %98 : vector<8x32xf32>
    %100 = arith.addf %1, %99 : vector<8x32xf32>
    %cst_42 = arith.constant dense<0.000000e+00> : vector<8xf32>
    %101 = vector.multi_reduction <add>, %100, %cst_42 [1] : vector<8x32xf32> to vector<8xf32>
    %102 = vector.shape_cast %101 : vector<8xf32> to vector<8x1xf32>
    %cst_43 = arith.constant 3.200000e+01 : f32
    %103 = vector.broadcast %cst_43 : f32 to vector<8x1xf32>
    %104 = arith.divf %102, %103 : vector<8x1xf32>
    %105 = vector.broadcast %104 : vector<8x1xf32> to vector<8x32xf32>
    %106 = arith.subf %100, %105 : vector<8x32xf32>
    %107 = arith.mulf %106, %106 : vector<8x32xf32>
    %cst_44 = arith.constant dense<0.000000e+00> : vector<8xf32>
    %108 = vector.multi_reduction <add>, %107, %cst_44 [1] : vector<8x32xf32> to vector<8xf32>
    %109 = vector.shape_cast %108 : vector<8xf32> to vector<8x1xf32>
    %cst_45 = arith.constant 3.200000e+01 : f32
    %110 = vector.broadcast %cst_45 : f32 to vector<8x1xf32>
    %111 = arith.divf %109, %110 : vector<8x1xf32>
    %112 = vector.broadcast %104 : vector<8x1xf32> to vector<8x32xf32>
    %113 = arith.subf %100, %112 : vector<8x32xf32>
    %cst_46 = arith.constant 9.99999974E-6 : f32
    %114 = vector.broadcast %cst_46 : f32 to vector<8x1xf32>
    %115 = arith.addf %111, %114 : vector<8x1xf32>
    %116 = math.rsqrt %115 : vector<8x1xf32>
    %117 = vector.broadcast %116 : vector<8x1xf32> to vector<8x32xf32>
    %118 = arith.mulf %113, %117 : vector<8x32xf32>
    %c0_47 = arith.constant 0 : index
    %c0_48 = arith.constant 0 : index
    %119 = vector.load %arg9[%c0_47, %c0_48] : memref<1x32xf32, #tpu.memory_space<vmem>>, vector<1x32xf32>
    %120 = vector.broadcast %119 : vector<1x32xf32> to vector<8x32xf32>
    %121 = arith.mulf %118, %120 : vector<8x32xf32>
    %c0_49 = arith.constant 0 : index
    %c0_50 = arith.constant 0 : index
    %122 = vector.load %arg10[%c0_49, %c0_50] : memref<1x32xf32, #tpu.memory_space<vmem>>, vector<1x32xf32>
    %123 = vector.broadcast %122 : vector<1x32xf32> to vector<8x32xf32>
    %124 = arith.addf %121, %123 : vector<8x32xf32>
    %c0_51 = arith.constant 0 : index
    %c0_52 = arith.constant 0 : index
    %125 = vector.load %arg5[%c0_51, %c0_52] : memref<32x32xf32, #tpu.memory_space<vmem>>, vector<32x32xf32>
    %cst_53 = arith.constant dense<0.000000e+00> : vector<8x32xf32>
    %126 = tpu.matmul %124, %125, %cst_53 {dimension_numbers = #tpu.dot_dimension_numbers<[1], [0], [0], [1], [0, 0, 1, 1], [], []>} : vector<8x32xf32>, vector<32x32xf32>, vector<8x32xf32> -> vector<8x32xf32>
    %c0_54 = arith.constant 0 : index
    %c0_55 = arith.constant 0 : index
    %127 = vector.load %arg6[%c0_54, %c0_55] : memref<1x32xf32, #tpu.memory_space<vmem>>, vector<1x32xf32>
    %128 = vector.broadcast %127 : vector<1x32xf32> to vector<8x32xf32>
    %129 = arith.addf %126, %128 : vector<8x32xf32>
    %cst_56 = arith.constant 0.000000e+00 : f32
    %130 = vector.broadcast %cst_56 : f32 to vector<8x32xf32>
    %131 = arith.cmpf ogt, %129, %130 : vector<8x32xf32>
    %cst_57 = arith.constant 1.000000e-01 : f32
    %132 = vector.broadcast %cst_57 : f32 to vector<8x32xf32>
    %133 = arith.mulf %132, %129 : vector<8x32xf32>
    %134 = arith.select %131, %129, %133 : vector<8x32xi1>, vector<8x32xf32>
    %c0_58 = arith.constant 0 : index
    %c0_59 = arith.constant 0 : index
    %135 = vector.load %arg7[%c0_58, %c0_59] : memref<32x32xf32, #tpu.memory_space<vmem>>, vector<32x32xf32>
    %cst_60 = arith.constant dense<0.000000e+00> : vector<8x32xf32>
    %136 = tpu.matmul %134, %135, %cst_60 {dimension_numbers = #tpu.dot_dimension_numbers<[1], [0], [0], [1], [0, 0, 1, 1], [], []>} : vector<8x32xf32>, vector<32x32xf32>, vector<8x32xf32> -> vector<8x32xf32>
    %c0_61 = arith.constant 0 : index
    %c0_62 = arith.constant 0 : index
    %137 = vector.load %arg8[%c0_61, %c0_62] : memref<1x32xf32, #tpu.memory_space<vmem>>, vector<1x32xf32>
    %138 = vector.broadcast %137 : vector<1x32xf32> to vector<8x32xf32>
    %139 = arith.addf %136, %138 : vector<8x32xf32>
    %140 = arith.addf %124, %139 : vector<8x32xf32>
    %cst_63 = arith.constant dense<0.000000e+00> : vector<8xf32>
    %141 = vector.multi_reduction <add>, %140, %cst_63 [1] : vector<8x32xf32> to vector<8xf32>
    %142 = vector.shape_cast %141 : vector<8xf32> to vector<8x1xf32>
    %cst_64 = arith.constant 3.200000e+01 : f32
    %143 = vector.broadcast %cst_64 : f32 to vector<8x1xf32>
    %144 = arith.divf %142, %143 : vector<8x1xf32>
    %145 = vector.broadcast %144 : vector<8x1xf32> to vector<8x32xf32>
    %146 = arith.subf %140, %145 : vector<8x32xf32>
    %147 = arith.mulf %146, %146 : vector<8x32xf32>
    %cst_65 = arith.constant dense<0.000000e+00> : vector<8xf32>
    %148 = vector.multi_reduction <add>, %147, %cst_65 [1] : vector<8x32xf32> to vector<8xf32>
    %149 = vector.shape_cast %148 : vector<8xf32> to vector<8x1xf32>
    %cst_66 = arith.constant 3.200000e+01 : f32
    %150 = vector.broadcast %cst_66 : f32 to vector<8x1xf32>
    %151 = arith.divf %149, %150 : vector<8x1xf32>
    %152 = vector.broadcast %144 : vector<8x1xf32> to vector<8x32xf32>
    %153 = arith.subf %140, %152 : vector<8x32xf32>
    %cst_67 = arith.constant 9.99999974E-6 : f32
    %154 = vector.broadcast %cst_67 : f32 to vector<8x1xf32>
    %155 = arith.addf %151, %154 : vector<8x1xf32>
    %156 = math.rsqrt %155 : vector<8x1xf32>
    %157 = vector.broadcast %156 : vector<8x1xf32> to vector<8x32xf32>
    %158 = arith.mulf %153, %157 : vector<8x32xf32>
    %c0_68 = arith.constant 0 : index
    %c0_69 = arith.constant 0 : index
    %159 = vector.load %arg11[%c0_68, %c0_69] : memref<1x32xf32, #tpu.memory_space<vmem>>, vector<1x32xf32>
    %160 = vector.broadcast %159 : vector<1x32xf32> to vector<8x32xf32>
    %161 = arith.mulf %158, %160 : vector<8x32xf32>
    %c0_70 = arith.constant 0 : index
    %c0_71 = arith.constant 0 : index
    %162 = vector.load %arg12[%c0_70, %c0_71] : memref<1x32xf32, #tpu.memory_space<vmem>>, vector<1x32xf32>
    %163 = vector.broadcast %162 : vector<1x32xf32> to vector<8x32xf32>
    %164 = arith.addf %161, %163 : vector<8x32xf32>
    %c0_72 = arith.constant 0 : index
    %c0_73 = arith.constant 0 : index
    %c0_74 = arith.constant 0 : index
    %165 = vector.load %arg13[%c0_72, %c0_73, %c0_74] : memref<1x8x32xf32, #tpu.memory_space<vmem>>, vector<1x8x32xf32>
    %166 = vector.shape_cast %165 : vector<1x8x32xf32> to vector<8x32xf32>
    %167 = vector.shape_cast %164 : vector<8x32xf32> to vector<1x8x32xf32>
    tpu.vector_store %arg13[%c0_72, %c0_73, %c0_74], %167 {strides = array<i32>} : memref<1x8x32xf32, #tpu.memory_space<vmem>>, vector<1x8x32xf32>,
    return
  }
  func.func @transform_0(%arg0: i32) -> (i32, i32, i32) {
    %c0_i32 = arith.constant 0 : i32
    %c0_i32_0 = arith.constant 0 : i32
    %c0_i32_1 = arith.constant 0 : i32
    return %arg0, %c0_i32, %c0_i32_0 : i32, i32, i32
  }
  func.func @transform_1(%arg0: i32) -> (i32, i32, i32) {
    %c0_i32 = arith.constant 0 : i32
    %c0_i32_0 = arith.constant 0 : i32
    %c0_i32_1 = arith.constant 0 : i32
    return %arg0, %c0_i32, %c0_i32_0 : i32, i32, i32
  }
  func.func @transform_2(%arg0: i32) -> (i32, i32) {
    %c0_i32 = arith.constant 0 : i32
    %c0_i32_0 = arith.constant 0 : i32
    %c0_i32_1 = arith.constant 0 : i32
    return %c0_i32, %c0_i32_0 : i32, i32
  }
  func.func @transform_3(%arg0: i32) -> (i32, i32) {
    %c0_i32 = arith.constant 0 : i32
    %c0_i32_0 = arith.constant 0 : i32
    %c0_i32_1 = arith.constant 0 : i32
    return %c0_i32, %c0_i32_0 : i32, i32
  }
  func.func @transform_4(%arg0: i32) -> (i32, i32) {
    %c0_i32 = arith.constant 0 : i32
    %c0_i32_0 = arith.constant 0 : i32
    %c0_i32_1 = arith.constant 0 : i32
    return %c0_i32, %c0_i32_0 : i32, i32
  }
  func.func @transform_5(%arg0: i32) -> (i32, i32) {
    %c0_i32 = arith.constant 0 : i32
    %c0_i32_0 = arith.constant 0 : i32
    %c0_i32_1 = arith.constant 0 : i32
    return %c0_i32, %c0_i32_0 : i32, i32
  }
  func.func @transform_6(%arg0: i32) -> (i32, i32) {
    %c0_i32 = arith.constant 0 : i32
    %c0_i32_0 = arith.constant 0 : i32
    %c0_i32_1 = arith.constant 0 : i32
    return %c0_i32, %c0_i32_0 : i32, i32
  }
  func.func @transform_7(%arg0: i32) -> (i32, i32) {
    %c0_i32 = arith.constant 0 : i32
    %c0_i32_0 = arith.constant 0 : i32
    %c0_i32_1 = arith.constant 0 : i32
    return %c0_i32, %c0_i32_0 : i32, i32
  }
  func.func @transform_8(%arg0: i32) -> (i32, i32) {
    %c0_i32 = arith.constant 0 : i32
    %c0_i32_0 = arith.constant 0 : i32
    %c0_i32_1 = arith.constant 0 : i32
    return %c0_i32, %c0_i32_0 : i32, i32
  }
  func.func @transform_9(%arg0: i32) -> (i32, i32) {
    %c0_i32 = arith.constant 0 : i32
    %c0_i32_0 = arith.constant 0 : i32
    %c0_i32_1 = arith.constant 0 : i32
    return %c0_i32, %c0_i32_0 : i32, i32
  }
  func.func @transform_10(%arg0: i32) -> (i32, i32) {
    %c0_i32 = arith.constant 0 : i32
    %c0_i32_0 = arith.constant 0 : i32
    %c0_i32_1 = arith.constant 0 : i32
    return %c0_i32, %c0_i32_0 : i32, i32
  }
  func.func @transform_11(%arg0: i32) -> (i32, i32) {
    %c0_i32 = arith.constant 0 : i32
    %c0_i32_0 = arith.constant 0 : i32
    %c0_i32_1 = arith.constant 0 : i32
    return %c0_i32, %c0_i32_0 : i32, i32
  }
  func.func @transform_12(%arg0: i32) -> (i32, i32, i32) {
    %c0_i32 = arith.constant 0 : i32
    %c0_i32_0 = arith.constant 0 : i32
    %c0_i32_1 = arith.constant 0 : i32
    return %arg0, %c0_i32, %c0_i32_0 : i32, i32, i32
  }
}

</mosaic_0001>

<bundles_post_ra>
// kernel: tpu_custom_call.1
= control target key start
LH: loop header
LB: loop body
LE: loop exit
PB: predicated region body
PF: predicated region fallthrough
CT: control target
= control target key end

     0   :  { %s2924_s0 = inlined_call_operand.hbm [shape: f32[2,8,32], index: 0, kind: input, shape index: {}]   ;;  %s2925_s1 = inlined_call_operand.vmem [shape: f32[2,1,8], index: 1, kind: input, shape index: {}]   ;;  %s2926_s2 = inlined_call_operand.hbm [shape: f32[32,32], index: 2, kind: input, shape index: {}]   ;;  %s2927_s3 = inlined_call_operand.hbm [shape: f32[32,32], index: 3, kind: input, shape index: {}]   ;;  %s2928_s4 = inlined_call_operand.hbm [shape: f32[32,32], index: 4, kind: input, shape index: {}]   ;;  %s2929_s5 = inlined_call_operand.vmem [shape: f32[1,32], index: 5, kind: input, shape index: {}]   ;;  %s2930_s6 = inlined_call_operand.hbm [shape: f32[32,32], index: 6, kind: input, shape index: {}]   ;;  %s2931_s7 = inlined_call_operand.vmem [shape: f32[1,32], index: 7, kind: input, shape index: {}]   ;;  %s2932_s8 = inlined_call_operand.vmem [shape: f32[1,32], index: 8, kind: input, shape index: {}]   ;;  %s2933_s9 = inlined_call_operand.vmem [shape: f32[1,32], index: 9, kind: input, shape index: {}]   ;;  %s2934_s10 = inlined_call_operand.vmem [shape: f32[1,32], index: 10, kind: input, shape index: {}]   ;;  %s2935_s11 = inlined_call_operand.vmem [shape: f32[1,32], index: 11, kind: input, shape index: {}]   ;;  %s2936_s12 = inlined_call_operand.hbm [shape: f32[2,8,32], index: 12, kind: output, shape index: {}]  }
   0x1   :  { %2941 = sst [smem:[#allocation16_spill]] %s2924_s0 }
   0x2   :  { %2942 = sst [smem:[#allocation17_spill]] %s2926_s2 }
   0x3   :  { %2943 = sst [smem:[#allocation18_spill]] %s2931_s7 }
   0x4   :  { %2944 = sst [smem:[#allocation19_spill]] %s2934_s10 }
   0x5   :  { %2945 = sst [smem:[#allocation20_spill]] %s2935_s11 }
   0x6   :  { %2946 = sst [smem:[#allocation21_spill]] %s2936_s12 }
   0x7   :  { %17 = vsyncpa [#allocation3], 0 }
   0x8   :  { %19 = vsyncpa [#allocation3 + $0x1], 0 }
   0x9   :  { %20 = vsyncpa [#allocation6], 0 }
   0xa   :  { %21 = vsyncpa [#allocation9], 0 }
   0xb   :  { %22 = vsyncpa [#allocation4], 0 }
   0xc   :  { %24 = vsyncpa [#allocation4 + $0x1], 0  ;;  %s2502_s21 = smov 0   ;;  %s2504_s22 = smov 0  }
   0xd   :  { %s2506_s23 = smov 0   ;;  %s2508_s24 = smov 0  }
   0xe LB: > { %s2422_s25 = smov [#allocation5]   ;;  %s2523_s27 = sadd.s32 4294967295, %s2420_s24   ;;  %s2420_s24 = sphi %s2508_s24, %s2973_s24   ;;  %s2416_s23 = sphi %s2506_s23, %s2972_s23   ;;  %s2412_s22 = sphi %s2504_s22, %s2971_s22   ;;  %s2408_s21 = sphi %s2502_s21, %s2970_s21  }
   0xf   : > { %s335_s26 = sshll.u32 %s2422_s25, 4  ;;  %p1894_p0 = scmp.ge.s32.totalorder %s2420_s24, 1  ;;  %s2528_s26 = int_to_ptr.vmem [resolvable:$true] %s335_s26 }
  0x10   : > { %p2938_p1 = scmp.eq.s32.totalorder %s2523_s27, 0  ;;  %p323_p2 = scmp.lt.s32.totalorder %s2420_s24, 3 }
  0x11   : > { %s2423_s29 = smov [#allocation8]   ;;  %s2424_s14 = smov [#allocation7]  }
  0x12   : > { %p2530_p3 = pnand %p1894_p0, %p323_p2  ;;  %s361_s30 = sshll.u32 %s2423_s29, 4  ;;  %s2543_s30 = int_to_ptr.vmem [resolvable:$true] %s361_s30 }
  0x13   : > { %s348_s15 = sshll.u32 %s2424_s14, 4  ;;  %s2949_s2 = sld [smem:[#allocation17_spill]]  ;;  %s2545_s15 = int_to_ptr.vmem [resolvable:$true] %s348_s15 }
  0x14   : > { %s2947_s28 = scalar_select %p2530_p3, 1, 0 }
  0x15   : > { %p2108_p5 = pneg %p2530_p3 }
  0x17   : > { %p2539_p6 = pnand %p2108_p5, %p2938_p1 }
  0x19   : > { %s2204_s18 = scalar_lea.hbm %s2949_s2, 512  ;;  %p2555_p8 = pneg %p2539_p6 }
  0x1a   : > { %p2205_p7 = scmp.ne.s32.totalorder %s2949_s2, %s2204_s18  ;;  %p2211_p11 = scmp.lt.u32.totalorder %s2204_s18, %s2949_s2 }
  0x1c   : > { %p2207_p9 = pnand %p2555_p8, %p2205_p7 }
  0x1e   : > { %p2208_p10 = pneg %p2207_p9 }
  0x20   : > { %p2213_p12 = pnand %p2211_p11, %p2208_p10 }
  0x22   : > { %2216 = shalt.err (!%p2213_p12)
}
  0x23   : > { %s2217_s16 = scalar_lea.vmem %s2528_s26, 512  ;;  %p2225_p5 = scmp.lt.s32.totalorder %s2528_s26, %s2528_s26 }
  0x24   : > { %p2218_p13 = scmp.ne.s32.totalorder %s2528_s26, %s2217_s16  ;;  %p2226_p4 = scmp.lt.s32.totalorder %s2217_s16, %s2217_s16 }
  0x26   : > { %p2220_p0 = pnand %p2218_p13, %p2555_p8  ;;  %p2227_p7 = por %p2226_p4, %p2225_p5 }
  0x28   : > { %p2221_p2 = pneg %p2220_p0 }
  0x2a   : > { %p2228_p9 = pnand %p2227_p7, %p2221_p2 }
  0x2c   : > { %2231 = shalt.err (!%p2228_p9)
}
  0x2d   : > { %s2425_s17 = smov 128   ;;  %s2426_s18 = smov 8  }
  0x2e   : > { %2111 = dma.hbm_to_vmem [thread:$0]  (!%p2539_p6), %s2949_s2, 512, %s2528_s26, [#allocation6], %s2425_s17, %s2425_s17, %s2426_s18  }
  0x2f   : > { %s2232_s16 = scalar_lea.hbm %s2928_s4, 512 }
  0x30   : > { %p2233_p4 = scmp.ne.s32.totalorder %s2928_s4, %s2232_s16  ;;  %p2239_p12 = scmp.lt.u32.totalorder %s2232_s16, %s2928_s4 }
  0x32   : > { %p2235_p10 = pnand %p2233_p4, %p2555_p8 }
  0x34   : > { %p2236_p11 = pneg %p2235_p10 }
  0x36   : > { %p2241_p13 = pnand %p2239_p12, %p2236_p11 }
  0x38   : > { %2244 = shalt.err (!%p2241_p13)
}
  0x39   : > { %s2245_s26 = scalar_lea.vmem %s2543_s30, 512  ;;  %p2253_p7 = scmp.lt.s32.totalorder %s2543_s30, %s2543_s30 }
  0x3a   : > { %p2246_p0 = scmp.ne.s32.totalorder %s2543_s30, %s2245_s26  ;;  %p2254_p9 = scmp.lt.s32.totalorder %s2245_s26, %s2245_s26 }
  0x3c   : > { %p2248_p2 = pnand %p2246_p0, %p2555_p8  ;;  %p2255_p4 = por %p2254_p9, %p2253_p7 }
  0x3e   : > { %p2249_p5 = pneg %p2248_p2 }
  0x40   : > { %p2256_p10 = pnand %p2255_p4, %p2249_p5 }
  0x42   : > { %2259 = shalt.err (!%p2256_p10)
}
  0x43   : > { %2117 = dma.hbm_to_vmem [thread:$0]  (!%p2539_p6), %s2928_s4, 512, %s2543_s30, [#allocation9], %s2425_s17, %s2425_s17, %s2426_s18  }
  0x44   : > { %s2260_s19 = scalar_lea.hbm %s2927_s3, 512 }
  0x45   : > { %p2261_p11 = scmp.ne.s32.totalorder %s2927_s3, %s2260_s19  ;;  %p2267_p0 = scmp.lt.u32.totalorder %s2260_s19, %s2927_s3 }
  0x47   : > { %p2263_p12 = pnand %p2261_p11, %p2555_p8 }
  0x49   : > { %p2264_p13 = pneg %p2263_p12 }
  0x4b   : > { %p2269_p2 = pnand %p2267_p0, %p2264_p13 }
  0x4d   : > { %2272 = shalt.err (!%p2269_p2)
}
  0x4e   : > { %s2273_s30 = scalar_lea.vmem %s2545_s15, 512  ;;  %p2281_p4 = scmp.lt.s32.totalorder %s2545_s15, %s2545_s15 }
  0x4f   : > { %p2274_p5 = scmp.ne.s32.totalorder %s2545_s15, %s2273_s30  ;;  %p2282_p10 = scmp.lt.s32.totalorder %s2273_s30, %s2273_s30 }
  0x51   : > { %p2276_p7 = pnand %p2274_p5, %p2555_p8  ;;  %p2283_p11 = por %p2282_p10, %p2281_p4 }
  0x53   : > { %p2277_p9 = pneg %p2276_p7 }
  0x55   : > { %p2284_p12 = pnand %p2283_p11, %p2277_p9 }
  0x57   : > { %2287 = shalt.err (!%p2284_p12)
}
  0x58   : > { %2114 = dma.hbm_to_vmem [thread:$0]  (!%p2539_p6), %s2927_s3, 512, %s2545_s15, [#allocation6], %s2425_s17, %s2425_s17, %s2426_s18  }
  0x59   : > { %s2427_s10 = smov [#allocation10]   ;;  %s2288_s20 = scalar_lea.hbm %s2930_s6, 512 }
  0x5a   : > { %s377_s11 = sshll.u32 %s2427_s10, 4  ;;  %p2289_p13 = scmp.ne.s32.totalorder %s2930_s6, %s2288_s20  ;;  %s378_s11 = int_to_ptr.vmem [resolvable:$true] %s377_s11 }
  0x5b   : > { %p2295_p5 = scmp.lt.u32.totalorder %s2288_s20, %s2930_s6 }
  0x5c   : > { %p2291_p0 = pnand %p2289_p13, %p2555_p8 }
  0x5e   : > { %p2292_p2 = pneg %p2291_p0 }
  0x60   : > { %p2297_p7 = pnand %p2295_p5, %p2292_p2 }
  0x62   : > { %2300 = shalt.err (!%p2297_p7)
}
  0x63   : > { %s2301_s15 = scalar_lea.vmem %s378_s11, 512  ;;  %p2309_p11 = scmp.lt.s32.totalorder %s378_s11, %s378_s11 }
  0x64   : > { %p2302_p9 = scmp.ne.s32.totalorder %s378_s11, %s2301_s15  ;;  %p2310_p12 = scmp.lt.s32.totalorder %s2301_s15, %s2301_s15 }
  0x66   : > { %p2304_p4 = pnand %p2302_p9, %p2555_p8  ;;  %p2311_p1 = por %p2310_p12, %p2309_p11 }
  0x68   : > { %p2305_p10 = pneg %p2304_p4 }
  0x6a   : > { %p2312_p3 = pnand %p2311_p1, %p2305_p10 }
  0x6c   : > { %2315 = shalt.err (!%p2312_p3)
}
  0x6d   : > { %2120 = dma.hbm_to_vmem [thread:$0]  (!%p2539_p6), %s2930_s6, 512, %s378_s11, [#allocation9], %s2425_s17, %s2425_s17, %s2426_s18  }
  0x6e   : > { %s1893_s13 = sadd.s32 4294967294, %s2420_s24   ;;  %s2654_s25 = sadd.s32 1, %s2420_s24  }
  0x6f   : > { %s34_s10 = ssub.s32 %s2420_s24, %s2654_s25  ;;  %s37_s12 = sadd.s32 1, %s2416_s23 }
  0x70   : > { %p35_p1 = scmp.eq.s32.totalorder %s34_s10, 0  ;;  %p44_p3 = scmp.ne.s32.totalorder %s2416_s23, %s2412_s22 }
  0x71   : > { %p45_p8 = scmp.eq.s32.totalorder %s2420_s24, 0  ;;  %p50_p13 = scmp.ne.s32.totalorder %s2412_s22, %s2408_s21 }
  0x72   : > { %s2665_s19 = scalar_select %p35_p1, %s2416_s23, %s37_s12  }
  0x73   : > { %p2667_p0 = por %p45_p8, %p44_p3  ;;  %p2952_p2 = scmp.eq.s32.totalorder %s2523_s27, 0 }
  0x74   : > { %p310_p5 = scmp.eq.s32.totalorder %s2523_s27, 1  ;;  %p316_p7 = scmp.eq.s32.totalorder %s1893_s13, 1 }
  0x75   : > { %p2673_p6 = por %p2952_p2, %p50_p13  ;;  %p2133_p9 = scmp.lt.s32.totalorder %s2420_s24, 2 }
  0x76   : > { %s406_s18 = sand.u32 1, %s2416_s23   ;;  %p2680_p4 = por %p310_p5, %p44_p3 }
  0x77   : > { %p2684_p10 = por %p316_p7, %p50_p13  ;;  %s1900_s14 = sshll.u32 %s406_s18, 3 }
  0x78   : > { %s2954_s11 = scalar_select %p2680_p4, 1, 0 }
  0x79   : > { %s2955_s29 = scalar_select %p2684_p10, 1, 0 }
  0x7a   : > { %s1901_s16 = sshll.u32 %s2420_s24, 7  ;;  %s2956_s0 = sld [smem:[#allocation16_spill]] }
  0x7b   : > { %s410_s7 = scalar_lea.vmem [#allocation2], %s1900_s14  ;;  %p2698_p11 = pnand %p2133_p9, %p2667_p0 }
  0x7c   : > { %s417_s13 = sshll.u32 %s410_s7, 4  ;;  %s407_s12 = scalar_lea.sflag [#allocation3], %s406_s18  ;;  %s2694_s13 = int_to_ptr.vmem [resolvable:$true] %s417_s13 }
  0x7d   : > { %p2318_p1 = pneg %p2698_p11 }
  0x80   : > { %s2692_s26 = scalar_lea.hbm %s2956_s0, %s1901_s16  ;;  %s2321_s30 = scalar_lea.hbm %s2956_s0, 256 }
  0x81   : > { %s2316_s2 = scalar_lea.hbm %s2692_s26, 128  ;;  %p2322_p13 = scmp.lt.u32.totalorder %s2692_s26, %s2956_s0 }
  0x82   : > { %p2317_p12 = scmp.ne.s32.totalorder %s2692_s26, %s2316_s2  ;;  %p2323_p0 = scmp.lt.u32.totalorder %s2321_s30, %s2316_s2 }
  0x83   : > { %p2325_p5 = scmp.lt.u32.totalorder %s2316_s2, %s2692_s26 }
  0x84   : > { %p2319_p3 = pnand %p2318_p1, %p2317_p12  ;;  %p2324_p2 = por %p2323_p0, %p2322_p13 }
  0x86   : > { %p2320_p8 = pneg %p2319_p3  ;;  %p2326_p7 = por %p2325_p5, %p2324_p2 }
  0x88   : > { %p2327_p9 = pnand %p2326_p7, %p2320_p8 }
  0x8a   : > { %2330 = shalt.err (!%p2327_p9)
}
  0x8b   : > { %s2331_s18 = scalar_lea.vmem %s2694_s13, 128  ;;  %s2428_s7 = smov [#allocation2]  }
  0x8c   : > { %p2332_p12 = scmp.ne.s32.totalorder %s2694_s13, %s2331_s18  ;;  %s2336_s14 = sshll.u32 %s2428_s7, 4  ;;  %s2337_s14 = int_to_ptr.vmem [resolvable:$false] %s2336_s14 }
  0x8d   : > { %s2338_s16 = scalar_lea.vmem %s2337_s14, 256  ;;  %p2339_p4 = scmp.lt.s32.totalorder %s2694_s13, %s2337_s14 }
  0x8e   : > { %p2334_p3 = pnand %p2332_p12, %p2318_p1  ;;  %p2340_p13 = scmp.lt.s32.totalorder %s2338_s16, %s2331_s18 }
  0x90   : > { %p2335_p10 = pneg %p2334_p3  ;;  %p2341_p0 = por %p2340_p13, %p2339_p4 }
  0x92   : > { %p2342_p2 = pnand %p2341_p0, %p2335_p10 }
  0x94   : > { %2345 = shalt.err (!%p2342_p2)
}
  0x95   : > { %2124 = dma.hbm_to_vmem [thread:$0]  (!%p2698_p11), %s2692_s26, 128, %s2694_s13, %s407_s12  }
  0x96   : > { %p2958_p8 = scmp.ne.s32.totalorder %s2947_s28, 0 }
  0x97   : > { %s2730_s2 = sand.u32 (!%p2958_p8), 1, %s2412_s22  }
  0x98   : > { %432 = sbr.rel (%p2958_p8) target bundleno = 3814 (0xee6), region = 68  ;;  %s1903_s30 = sshll.u32 (!%p2958_p8), %s2730_s2, 3 }
  0x99   : > { %s435_s20 = scalar_lea.sflag (!%p2958_p8), [#allocation3], %s2730_s2  ;;  %s438_s15 = scalar_lea.vmem (!%p2958_p8), [#allocation2], %s1903_s30 }
  0x9f   : > { %2391 = dma.done.wait (%p2673_p6), %s435_s20, 128  }
  0xa0   : > { %2393 = vsyncadd (%p2673_p6), %s435_s20, 4294967168  ;;  %p2959_p4 = scmp.eq.s32.totalorder %s2523_s27, 0 }
  0xa2   : > { %2395 = dma.done.wait (%p2959_p4), [#allocation6], 1024   ;;  %p2960_p10 = pmov %p2959_p4 }
  0xa3   : > { %p2961_p11 = pmov %p2959_p4 }
  0xa4   : > { %2397 = vsyncadd (%p2960_p10), [#allocation6], 4294966272 }
  0xa5   : > { %2399 = dma.done.wait (%p2961_p11), [#allocation9], 1024   ;;  %p2962_p1 = pmov %p2959_p4 }
  0xa6   : > { %v2429_v0 = vmov 0.0|0.0   ;;  %vm2430_vm0 = vmmov 0   ;;  %v2431_v1 = vmov 0.0   ;;  %v503_v2 = vld [vmem:[#allocation5] sm:$0xff]  ;;  %v504_v3 = vld [vmem:[#allocation5 + $0x8] sm:$0xff]  ;;  %v505_v4 = vld [vmem:[#allocation5 + $0x10] sm:$0xff]  ;;  %v662_v12 = vlaneseq }
  0xa7   : > { %2401 = vsyncadd (%p2962_p1), [#allocation9], 4294966272  ;;  %2070 = vmatprep.subr.bf16.mxu0 %v2429_v0  ;;  %1985 = vmatprep.mubr.msk.f32.mxu0 %vm2430_vm0, %v2431_v1  ;;  %v2071_v5 = vpack.c.bf16 %v504_v3, %v503_v2  ;;  %v506_v6 = vld [vmem:[#allocation5 + $0x18] sm:$0xff]  ;;  %vm507_vm1 = vcmask 261120   ;;  %vm585_vm2 = vcmask 64512   ;;  %s2432_s28 = smov 120  }
  0xa8   : > { %1988 = vmatprep.subr.mxu1 %v2431_v1  ;;  %1990 = vmatprep.mubr.msk.f32.mxu1 %vm2430_vm0, %v2431_v1  ;;  %v2074_v7 = vpack.c.bf16 %v506_v6, %v505_v4  ;;  %v2755_v8 = vld [vmem:[%s438_s15] sm:$0xff]  ;;  %p498_p6 = scmp.lt.s32.totalorder %s2523_s27, 1  ;;  %v663_v14 = vshrl.u32 %v662_v12, 7  ;;  %v2433_v16 = vmov 0   ;;  %s2434_s12 = smov 112   ;;  %v582_v42 = vld [vmem:[#allocation7 + $0x8] sm:$0xff] }
  0xa9   : > { %2072 = vmatpush3.bf16.msra.mxu0 %v2071_v5  ;;  %v581_v46 = vld [vmem:[#allocation7] sm:$0xff]  ;;  %s2435_s18 = smov 104   ;;  %v583_v5 = vld [vmem:[#allocation7 + $0x10] sm:$0xff]  ;;  %s2963_s13 = sld [smem:[#allocation18_spill]] }
  0xaa   : > { %2073 = vmatprep.subr.bf16.mxu0 %v2429_v0  ;;  %s499_s17 = scalar_select %p498_p6, %s2523_s27, 1  ;;  %v664_v15 = vsub.s32 0, %v663_v14 }
  0xab   : > { %s2965_s16 = sld [smem:[#allocation20_spill]]  ;;  %s1935_s20 = sshll.u32 %s2523_s27, 7 }
  0xac   : > { %s500_s10 = scalar_lea.vmem %s2925_s1, %s499_s17  ;;  %s497_s15 = scalar_lea.vmem [#allocation11], %s1903_s30 }
  0xad   : > { %2075 = vmatpush3.bf16.msra.mxu0 %v2074_v7  ;;  %v502_v13 = vld [vmem:[%s500_s10] sm:$0x1]  ;;  %s1763_s10 = scalar_lea.sflag [#allocation4], %s2730_s2  ;;  %p2967_p7 = scmp.ne.s32.totalorder %s2954_s11, 0 }
  0xae   : > { %1998 = vmatprep.subr.mxu0 %v2431_v1  ;;  %vm660_vm3 = vcmp.gt.f32.partialorder %v502_v13, 0.0  ;;  %s2436_s27 = smov [#allocation11]  }
  0xaf   : > { %v661_v17 = vsel %vm660_vm3, 1, %v2433_v16  ;;  %s2350_s30 = sshll.u32 %s2436_s27, 4  ;;  %s2351_s30 = int_to_ptr.vmem [resolvable:$false] %s2350_s30 }
  0xb0   : > { %1986 = vmatmul.mubr.msk.f32.vlgmr.msra.gmra.mrb[0].mxu0 %vm507_vm1, %v2755_v8  ;;  %v2784_v18 = vrot.slane %v661_v17, %v664_v15 }
  0xb1   : > { %2000 = vmatprep.mubr.msk.f32.mxu0 %vm2430_vm0, %v2431_v1 }
  0xb2   : > { %vm666_vm4 = vcmp.eq.s32.totalorder %v2784_v18, 1 }
 0x183   : > { %v2762_v9 = vpop.f32.mrb[0].mxu0 }
 0x184   : > { %752 = vrot.lane.b32.xlu0 %v2762_v9, %s2432_s28  ;;  %v1987_v10 = vpop.f32.mrb[1].mxu0  ;;  %1989 = vmatpush3.xpose.msk.msra.mxu1 %vm585_vm2, %v2762_v9  ;;  %s1776_s28 = sshll.u32 %s497_s15, 4  ;;  %s2881_s28 = int_to_ptr.vmem [resolvable:$true] %s1776_s28 }
 0x185   : > { %1993 = vmatprep.subr.mxu1 %v2431_v1  ;;  %p2353_p3 = scmp.lt.s32.totalorder %s2881_s28, %s2351_s30 }
 0x187   : > { %1991 = vmatmul.mubr.msk.f32.vlgmr.msra.gmra.mrb[0].mxu1 %vm585_vm2, %v2762_v9 }
 0x188   : > { %1994 = vmatpush3.msra.mxu1 %v2762_v9  ;;  %1995 = vmatprep.mubr.msk.f32.mxu1 %vm2430_vm0, %v2431_v1 }
 0x189   : > { %2003 = vmatprep.subr.mxu1 %v2431_v1 }
 0x1f6   : > { %v753_v11 = vpop.permute.xlu0 %752 }
 0x1f7   : > { %1999 = vmatpush3.xpose.msk.msra.mxu0 %vm585_vm2, %v753_v11 }
 0x1f8   : > { %2008 = vmatprep.subr.mxu0 %v2431_v1 }
 0x1fa   : > { %2001 = vmatmul.mubr.msk.f32.vlgmr.msra.gmra.mrb[2].mxu0 %vm585_vm2, %v753_v11 }
 0x1fb   : > { %2010 = vmatprep.mubr.msk.f32.mxu0 %vm2430_vm0, %v2431_v1  ;;  %2009 = vmatpush3.msra.mxu0 %v582_v42  ;;  %v1560_v42 = vld [vmem:[#allocation8] sm:$0xff] }
 0x1fc   : > { %2018 = vmatprep.subr.mxu0 %v2431_v1 }
 0x25a   : > { %v655_v19 = vpop.f32.mrb[0].mxu1 }
 0x25b   : > { %v659_v20 = vmul.f32 0.35355338, %v655_v19  ;;  %v1992_v21 = vpop.f32.mrb[1].mxu1 }
 0x25d   : > { %v667_v22 = vsel %vm666_vm4, -inf, %v659_v20 }
 0x25e   : > { %v668_v23 = vsel %vm585_vm2, %v667_v22, -inf }
 0x25f   : > { %669 = vmax.xlane.f32.xlu0 %v668_v23 }
 0x2cd   : > { %v822_v24 = vpop.f32.mrb[2].mxu0 }
 0x2ce   : > { %v826_v25 = vmul.f32 0.35355338, %v822_v24  ;;  %v2002_v26 = vpop.f32.mrb[3].mxu0  ;;  %v584_v24 = vld [vmem:[#allocation7 + $0x18] sm:$0xff] }
 0x2d0   : > { %v827_v27 = vsel %vm666_vm4, -inf, %v826_v25 }
 0x2d1   : > { %v828_v28 = vsel %vm585_vm2, %v827_v27, -inf }
 0x2d2   : > { %829 = vmax.xlane.f32.xlu1 %v828_v28 }
 0x2ec   : > { %v670_v29 = vpop.xlane.xlu0 %669 }
 0x2ed   : > { %v671_v30 = vsub.f32 %v667_v22, %v670_v29 }
 0x2ef   : > { %v672_v31 = vmul.f32 1.442695, %v671_v30 }
 0x2f1   : > { %2184 = vpow2.f32 %v672_v31 }
 0x2fb   : > { %v2185_v32 = vpop.eup %2184 }
 0x2fc   : > { %v674_v33 = vsel %vm585_vm2, %v2185_v32, 0.0 }
 0x2fd   : > { %675 = vadd.xlane.f32.xlu1 %v674_v33 }
 0x35f   : > { %v830_v34 = vpop.xlane.xlu1 %829 }
 0x360   : > { %v831_v35 = vsub.f32 %v827_v27, %v830_v34 }
 0x362   : > { %v832_v36 = vmul.f32 1.442695, %v831_v35 }
 0x364   : > { %2186 = vpow2.f32 %v832_v36 }
 0x36e   : > { %v2187_v37 = vpop.eup %2186 }
 0x36f   : > { %v834_v38 = vsel %vm585_vm2, %v2187_v37, 0.0 }
 0x370   : > { %835 = vadd.xlane.f32.xlu1 %v834_v38 }
 0x381   : > { %1059 = vrot.lane.b32.xlu1 %v2762_v9, %s2434_s12  ;;  %s2346_s12 = scalar_lea.vmem %s2881_s28, 128 }
 0x382   : > { %p2347_p5 = scmp.ne.s32.totalorder %s2881_s28, %s2346_s12 }
 0x384   : > { %p2348_p9 = pnand %p2347_p5, %p2967_p7 }
 0x386   : > { %p2349_p12 = pneg %p2348_p9 }
 0x38a   : > { %v676_v39 = vpop.xlane.xlu1 %675 }
 0x38b   : > { %2188 = vrcp.f32 %v676_v39 }
 0x395   : > { %v2189_v40 = vpop.eup %2188 }
 0x396   : > { %v678_v41 = vmul.f32 %v2189_v40, %v2185_v32 }
 0x398   : > { %1996 = vmatmul.mubr.msk.f32.vlgmr.msra.gmra.mrb[2].mxu1 %vm585_vm2, %v678_v41 }
 0x399   : > { %2004 = vmatpush3.msra.mxu1 %v753_v11  ;;  %2005 = vmatprep.mubr.msk.f32.mxu1 %vm2430_vm0, %v2431_v1 }
 0x39a   : > { %2013 = vmatprep.subr.mxu1 %v2431_v1 }
 0x3fd   : > { %v836_v43 = vpop.xlane.xlu1 %835 }
 0x3fe   : > { %2190 = vrcp.f32 %v836_v43  ;;  %v1561_v43 = vld [vmem:[#allocation8 + $0x8] sm:$0xff] }
 0x401   : > { %v1060_v48 = vpop.permute.xlu1 %1059 }
 0x408   : > { %v2191_v44 = vpop.eup %2190 }
 0x409   : > { %v838_v45 = vmul.f32 %v2191_v44, %v2187_v37  ;;  %v2077_v44 = vpack.c.bf16 %v1561_v43, %v1560_v42 }
 0x40b   : > { %2006 = vmatmul.mubr.msk.f32.vlgmr.msra.gmra.mrb[4].mxu1 %vm585_vm2, %v838_v45  ;;  %v1563_v45 = vld [vmem:[#allocation8 + $0x18] sm:$0xff] }
 0x40c   : > { %2014 = vmatpush3.msra.mxu1 %v581_v46  ;;  %2015 = vmatprep.mubr.msk.f32.mxu1 %vm2430_vm0, %v2431_v1 }
 0x40d   : > { %2023 = vmatprep.subr.mxu1 %v2431_v1 }
 0x46b   : > { %v748_v47 = vpop.f32.mrb[2].mxu1 }
 0x46c   : > { %v1997_v49 = vpop.f32.mrb[3].mxu1  ;;  %2016 = vmatmul.mubr.msk.f32.vlgmr.msra.gmra.mrb[6].mxu1 %vm585_vm2, %v748_v47  ;;  %v1648_v47 = vld [vmem:[#allocation10 + $0x8] sm:$0xff] }
 0x46d   : > { %2024 = vmatpush3.msra.mxu1 %v1060_v48  ;;  %2025 = vmatprep.mubr.msk.f32.mxu1 %vm2430_vm0, %v2431_v1 }
 0x46e   : > { %2033 = vmatprep.subr.mxu1 %v2431_v1 }
 0x4de   : > { %v909_v50 = vpop.f32.mrb[4].mxu1 }
 0x4df   : > { %v2007_v51 = vpop.f32.mrb[5].mxu1  ;;  %2011 = vmatmul.mubr.msk.f32.vlgmr.msra.gmra.mrb[4].mxu0 %vm585_vm2, %v909_v50 }
 0x4e0   : > { %2019 = vmatpush3.xpose.msk.msra.mxu0 %vm585_vm2, %v1060_v48  ;;  %2020 = vmatprep.mubr.msk.f32.mxu0 %vm2430_vm0, %v2431_v1 }
 0x4e1   : > { %2028 = vmatprep.subr.mxu0 %v2431_v1 }
 0x4e3   : > { %2021 = vmatmul.mubr.msk.f32.vlgmr.msra.gmra.mrb[6].mxu0 %vm585_vm2, %v1060_v48 }
 0x4e4   : > { %2030 = vmatprep.mubr.msk.f32.mxu0 %vm2430_vm0, %v2431_v1  ;;  %2029 = vmatpush3.msra.mxu0 %v583_v5 }
 0x4e5   : > { %2038 = vmatprep.subr.mxu0 %v2431_v1 }
 0x53f   : > { %v1055_v52 = vpop.f32.mrb[6].mxu1 }
 0x540   : > { %v2017_v53 = vpop.f32.mrb[7].mxu1 }
 0x541   : > { %v1926_v53 = vld [vmem:[%s2932_s8] ss:$0 sm:$0xff] }
 0x5b2   : > { %v982_v54 = vpop.f32.mrb[4].mxu0 }
 0x5b3   : > { %v1056_v55 = vadd.f32 %v1055_v52, %v982_v54  ;;  %v2012_v56 = vpop.f32.mrb[5].mxu0 }
 0x5b6   : > { %v1129_v57 = vpop.f32.mrb[6].mxu0 }
 0x5b7   : > { %v1133_v58 = vmul.f32 0.35355338, %v1129_v57  ;;  %v2022_v59 = vpop.f32.mrb[7].mxu0 }
 0x5b9   : > { %v1134_v60 = vsel %vm666_vm4, -inf, %v1133_v58  ;;  %v1649_v58 = vld [vmem:[#allocation10 + $0x10] sm:$0xff] }
 0x5ba   : > { %v1135_v61 = vsel %vm585_vm2, %v1134_v60, -inf }
 0x5bb   : > { %1136 = vmax.xlane.f32.xlu1 %v1135_v61 }
 0x648   : > { %v1137_v62 = vpop.xlane.xlu1 %1136 }
 0x649   : > { %v1138_v63 = vsub.f32 %v1134_v60, %v1137_v62  ;;  %v1928_v60 = vld [vmem:[%s2929_s5] ss:$0 sm:$0xff] }
 0x64b   : > { %v1139_v2 = vmul.f32 1.442695, %v1138_v63 }
 0x64d   : > { %2192 = vpow2.f32 %v1139_v2 }
 0x657   : > { %v2193_v3 = vpop.eup %2192 }
 0x658   : > { %v1141_v4 = vsel %vm585_vm2, %v2193_v3, 0.0 }
 0x659   : > { %1142 = vadd.xlane.f32.xlu0 %v1141_v4  ;;  %v1930_v4 = vld [vmem:[%s2963_s13] ss:$0 sm:$0xff]  ;;  %s2966_s13 = sld [smem:[#allocation21_spill]] }
 0x65f   : > { %s2879_s0 = scalar_lea.hbm %s2966_s13, %s1935_s20 }
 0x66f   : > { %1294 = vrot.lane.b32.xlu0 %v2762_v9, %s2435_s18  ;;  %s2964_s18 = sld [smem:[#allocation19_spill]] }
 0x6e6   : > { %v1143_v6 = vpop.xlane.xlu0 %1142 }
 0x6e7   : > { %2194 = vrcp.f32 %v1143_v6 }
 0x6ea   : > { %v1295_v11 = vpop.permute.xlu0 %1294 }
 0x6f1   : > { %v2195_v7 = vpop.eup %2194 }
 0x6f2   : > { %v1145_v10 = vmul.f32 %v2195_v7, %v2193_v3 }
 0x6f4   : > { %2026 = vmatmul.mubr.msk.f32.vlgmr.msra.gmra.mrb[8].mxu1 %vm585_vm2, %v1145_v10 }
 0x6f5   : > { %2034 = vmatpush3.xpose.msk.msra.mxu1 %vm585_vm2, %v1295_v11  ;;  %2035 = vmatprep.mubr.msk.f32.mxu1 %vm2430_vm0, %v2431_v1 }
 0x6f6   : > { %2043 = vmatprep.subr.mxu1 %v2431_v1 }
 0x6f8   : > { %2036 = vmatmul.mubr.msk.f32.vlgmr.msra.gmra.mrb[10].mxu1 %vm585_vm2, %v1295_v11 }
 0x6f9   : > { %2045 = vmatprep.mubr.msk.f32.mxu1 %vm2430_vm0, %v2431_v1  ;;  %2044 = vmatpush3.msra.mxu1 %v584_v24 }
 0x6fa   : > { %2082 = vmatprep.subr.bf16.mxu1 %v2429_v0 }
 0x7c7   : > { %v1216_v9 = vpop.f32.mrb[8].mxu1 }
 0x7c8   : > { %v2027_v12 = vpop.f32.mrb[9].mxu1  ;;  %2031 = vmatmul.mubr.msk.f32.vlgmr.msra.gmra.mrb[8].mxu0 %vm585_vm2, %v1216_v9 }
 0x7c9   : > { %2039 = vmatpush3.msra.mxu0 %v1295_v11  ;;  %2040 = vmatprep.mubr.msk.f32.mxu0 %vm2430_vm0, %v2431_v1 }
 0x7ca   : > { %2076 = vmatprep.subr.bf16.mxu0 %v2429_v0 }
 0x7cb   : > { %v1364_v13 = vpop.f32.mrb[10].mxu1 }
 0x7cc   : > { %v1368_v14 = vmul.f32 0.35355338, %v1364_v13  ;;  %v2037_v15 = vpop.f32.mrb[11].mxu1 }
 0x7ce   : > { %v1369_v16 = vsel %vm666_vm4, -inf, %v1368_v14 }
 0x7cf   : > { %v1370_v17 = vsel %vm585_vm2, %v1369_v16, -inf }
 0x7d0   : > { %1371 = vmax.xlane.f32.xlu0 %v1370_v17 }
 0x85d   : > { %v1372_v19 = vpop.xlane.xlu0 %1371 }
 0x85e   : > { %v1373_v20 = vsub.f32 %v1369_v16, %v1372_v19 }
 0x860   : > { %v1374_v21 = vmul.f32 1.442695, %v1373_v20 }
 0x862   : > { %2196 = vpow2.f32 %v1374_v21  ;;  %v1932_v21 = vld [vmem:[%s2964_s18] ss:$0 sm:$0xff]  ;;  %s2352_s18 = scalar_lea.vmem %s2351_s30, 256 }
 0x863   : > { %p2354_p13 = scmp.lt.s32.totalorder %s2352_s18, %s2346_s12 }
 0x865   : > { %p2355_p0 = por %p2354_p13, %p2353_p3 }
 0x867   : > { %p2356_p2 = pnand %p2355_p0, %p2349_p12 }
 0x86c   : > { %v2197_v22 = vpop.eup %2196 }
 0x86d   : > { %v1376_v23 = vsel %vm585_vm2, %v2197_v22, 0.0 }
 0x86e   : > { %1377 = vadd.xlane.f32.xlu1 %v1376_v23  ;;  %v1933_v23 = vld [vmem:[%s2965_s16] ss:$0 sm:$0xff] }
 0x89b   : > { %v1289_v25 = vpop.f32.mrb[8].mxu0 }
 0x89c   : > { %v1293_v26 = vadd.f32 %v1289_v25, %v1056_v55  ;;  %v2032_v27 = vpop.f32.mrb[9].mxu0  ;;  %v1927_v55 = vld [vmem:[%s2933_s9] ss:$0 sm:$0xff] }
 0x8fb   : > { %v1378_v18 = vpop.xlane.xlu1 %1377 }
 0x8fc   : > { %2198 = vrcp.f32 %v1378_v18 }
 0x906   : > { %v2199_v28 = vpop.eup %2198 }
 0x907   : > { %v1380_v29 = vmul.f32 %v2199_v28, %v2197_v22 }
 0x909   : > { %2041 = vmatmul.mubr.msk.f32.vlgmr.msra.gmra.mrb[10].mxu0 %vm585_vm2, %v1380_v29 }
 0x90a   : > { %2056 = vmatprep.mubr.msk.f32.mxu0 %vm2430_vm0, %v2431_v1  ;;  %2078 = vmatpush3.bf16.msra.mxu0 %v2077_v44 }
 0x90b   : > { %2079 = vmatprep.subr.bf16.mxu0 %v2429_v0 }
 0x9dc   : > { %v1451_v30 = vpop.f32.mrb[10].mxu0 }
 0x9dd   : > { %v2042_v31 = vpop.f32.mrb[11].mxu0  ;;  %2046 = vmatmul.mubr.msk.f32.vlgmr.msra.gmra.mrb[12].mxu1 %vm585_vm2, %v1451_v30 }
 0x9de   : > { %2067 = vmatprep.mubr.msk.f32.mxu1 %vm2430_vm0, %v2431_v1  ;;  %v1562_v1 = vld [vmem:[#allocation8 + $0x10] sm:$0xff] }
 0x9df   : > { %v2080_v46 = vpack.c.bf16 %v1563_v45, %v1562_v1 }
 0x9e1   : > { %2081 = vmatpush3.bf16.msra.mxu0 %v2080_v46 }
 0xab0   : > { %v1524_v32 = vpop.f32.mrb[12].mxu1 }
 0xab1   : > { %v1528_v33 = vadd.f32 %v1524_v32, %v1293_v26  ;;  %v2047_v34 = vpop.f32.mrb[13].mxu1 }
 0xab3   : > { %v1529_v35 = vadd.f32 %v1528_v33, %v2755_v8  ;;  %v1647_v8 = vld [vmem:[#allocation10] sm:$0xff] }
 0xab4   : > { %v2083_v48 = vpack.c.bf16 %v1648_v47, %v1647_v8 }
 0xab5   : > { %v1530_v36 = vsel %vm507_vm1, %v1529_v35, 0.0 }
 0xab6   : > { %1531 = vadd.xlane.f32.xlu1 %v1530_v36  ;;  %2084 = vmatpush3.bf16.msra.mxu1 %v2083_v48 }
 0xab7   : > { %2085 = vmatprep.subr.bf16.mxu1 %v2429_v0  ;;  %v1650_v0 = vld [vmem:[#allocation10 + $0x18] sm:$0xff] }
 0xab8   : > { %v2086_v59 = vpack.c.bf16 %v1650_v0, %v1649_v58 }
 0xaba   : > { %2087 = vmatpush3.bf16.msra.mxu1 %v2086_v59 }
 0xb43   : > { %v1532_v37 = vpop.xlane.xlu1 %1531 }
 0xb44   : > { %v1534_v38 = vmul.f32 0.03125, %v1532_v37 }
 0xb46   : > { %v1535_v39 = vsub.f32 %v1529_v35, %v1534_v38 }
 0xb48   : > { %v1536_v40 = vmul.f32 %v1535_v39, %v1535_v39 }
 0xb4a   : > { %v1537_v41 = vsel %vm507_vm1, %v1536_v40, 0.0 }
 0xb4b   : > { %1538 = vadd.xlane.f32.xlu1 %v1537_v41 }
 0xbd8   : > { %v1539_v49 = vpop.xlane.xlu1 %1538 }
 0xbd9   : > { %v1540_v50 = vmul.f32 0.03125, %v1539_v49 }
 0xbdb   : > { %v1541_v51 = vadd.f32 1e-05, %v1540_v50 }
 0xbdd   : > { %2200 = vrsqrt.f32 %v1541_v51 }
 0xbe7   : > { %v2201_v52 = vpop.eup %2200 }
 0xbe8   : > { %v1543_v54 = vmul.f32 %v2201_v52, %v1535_v39 }
 0xbea   : > { %v1551_v56 = vmul.f32 %v1926_v53, %v1543_v54 }
 0xbec   : > { %v1559_v57 = vadd.f32 %v1927_v55, %v1551_v56 }
 0xbee   : > { %2057 = vmatmul.mubr.msk.f32.vlgmr.msra.gmra.mrb[12].mxu0 %vm507_vm1, %v1559_v57 }
 0xcc1   : > { %v1640_v61 = vpop.f32.mrb[12].mxu0 }
 0xcc2   : > { %v1641_v62 = vadd.f32 %v1928_v60, %v1640_v61  ;;  %v2058_v63 = vpop.f32.mrb[13].mxu0 }
 0xcc4   : > { %vm1644_vm5 = vcmp.gt.f32.partialorder %v1641_v62, 0.0  ;;  %v1645_v2 = vmul.f32 0.1, %v1641_v62 }
 0xcc6   : > { %v1646_v3 = vsel %vm1644_vm5, %v1641_v62, %v1645_v2 }
 0xcc7   : > { %2068 = vmatmul.mubr.msk.f32.vlgmr.msra.gmra.mrb[14].mxu1 %vm507_vm1, %v1646_v3 }
 0xd9a   : > { %v1727_v5 = vpop.f32.mrb[14].mxu1 }
 0xd9b   : > { %v1728_v6 = vadd.f32 %v1930_v4, %v1727_v5  ;;  %v2069_v7 = vpop.f32.mrb[15].mxu1 }
 0xd9d   : > { %v1731_v10 = vadd.f32 %v1728_v6, %v1559_v57 }
 0xd9f   : > { %v1732_v11 = vsel %vm507_vm1, %v1731_v10, 0.0 }
 0xda0   : > { %1733 = vadd.xlane.f32.xlu1 %v1732_v11 }
 0xe2d   : > { %v1734_v9 = vpop.xlane.xlu1 %1733 }
 0xe2e   : > { %v1735_v12 = vmul.f32 0.03125, %v1734_v9 }
 0xe30   : > { %v1736_v13 = vsub.f32 %v1731_v10, %v1735_v12 }
 0xe32   : > { %v1737_v14 = vmul.f32 %v1736_v13, %v1736_v13 }
 0xe34   : > { %v1738_v15 = vsel %vm507_vm1, %v1737_v14, 0.0 }
 0xe35   : > { %1739 = vadd.xlane.f32.xlu1 %v1738_v15 }
 0xec2   : > { %v1740_v16 = vpop.xlane.xlu1 %1739 }
 0xec3   : > { %v1741_v17 = vmul.f32 0.03125, %v1740_v16 }
 0xec5   : > { %v1742_v19 = vadd.f32 1e-05, %v1741_v17 }
 0xec7   : > { %2202 = vrsqrt.f32 %v1742_v19 }
 0xed1   : > { %v2203_v20 = vpop.eup %2202 }
 0xed2   : > { %v1744_v22 = vmul.f32 %v2203_v20, %v1736_v13 }
 0xed4   : > { %v1752_v24 = vmul.f32 %v1932_v21, %v1744_v22 }
 0xed6   : > { %v1760_v25 = vadd.f32 %v1933_v23, %v1752_v24 }
 0xed8   : > { %1761 = vst.msk [vmem:[%s497_s15] sm:$0xff] %vm507_vm1, %v1760_v25 }
 0xed9   : > { %2359 = shalt.err (!%p2356_p2)
}
 0xeda   : > { %s2360_s2 = scalar_lea.hbm %s2879_s0, 128  ;;  %s2364_s16 = scalar_lea.hbm %s2966_s13, 256 }
 0xedb   : > { %p2361_p8 = scmp.ne.s32.totalorder %s2879_s0, %s2360_s2  ;;  %p2365_p11 = scmp.lt.u32.totalorder %s2879_s0, %s2966_s13 }
 0xedc   : > { %p2366_p1 = scmp.lt.u32.totalorder %s2364_s16, %s2360_s2  ;;  %p2368_p5 = scmp.lt.u32.totalorder %s2360_s2, %s2879_s0 }
 0xedd   : > { %p2362_p4 = pnand %p2361_p8, %p2967_p7 }
 0xede   : > { %p2367_p6 = por %p2366_p1, %p2365_p11 }
 0xedf   : > { %p2363_p10 = pneg %p2362_p4 }
 0xee0   : > { %p2369_p9 = por %p2368_p5, %p2367_p6 }
 0xee2   : > { %p2370_p12 = pnand %p2369_p9, %p2363_p10 }
 0xee4   : > { %2373 = shalt.err (!%p2370_p12)
}
 0xee5   : > { %2106 = dma.vmem_to_hbm [thread:$0]  (%p2967_p7), %s2881_s28, 128, %s2879_s0, %s1763_s10  }
 0xee6 PF: > { %s1788_s17 = sand.u32 1, %s2408_s21   ;;  %p2968_p3 = scmp.ne.s32.totalorder %s2955_s29, 0 }
 0xee7   : > { %p2969_p13 = scmp.ge.s32.totalorder %s2420_s24, 2  ;;  %s1789_s26 = scalar_lea.sflag [#allocation4], %s1788_s17 }
 0xee9   : > { %p2126_p0 = pnand %p2969_p13, %p2968_p3 }
 0xeeb   : > { %2403 = dma.done.wait (!%p2126_p0), %s1789_s26, 128  }
 0xeec   : > { %2405 = vsyncadd (!%p2126_p0), %s1789_s26, 4294967168  ;;  %p27_p2 = scmp.ge.s32.totalorder %s2654_s25, 4   ;;  %s2970_s21 = smov %s2412_s22 }
 0xeed   : > { %s2971_s22 = smov %s2416_s23  ;;  %s2972_s23 = smov %s2665_s19 }
 0xeee   : > { %s2973_s24 = smov %s2654_s25  ;;  %29 = sbr.rel (!%p27_p2) target bundleno = 14 (0xe), region = 132 }
 0xef5   :  { %1794 = vsyncpa [#allocation3], 1 }
 0xef6   :  { %1796 = vsyncpa [#allocation3 + $0x1], 1 }
 0xef7   :  { %1797 = vsyncpa [#allocation6], 1 }
 0xef8   :  { %1798 = vsyncpa [#allocation9], 1 }
 0xef9   :  { %1799 = vsyncpa [#allocation4], 1 }
 0xefa   :  { %1801 = vsyncpa [#allocation4 + $0x1], 1 }

</bundles_post_ra>
